<compile_context>
chip_gen: v7x
topology: tpu7x:2x2x1
jax: 0.10.0
libtpu: 0.0.40
codegen_flags: <defaults>
</compile_context>

<pallas_src>
import jax
import jax.numpy as jnp
from jax.experimental import pallas as pl
from jax.experimental.pallas import tpu as pltpu


def _round_up(n, m):
    return -(-n // m) * m


def _mlp_kernel(x_ref, w1_ref, b1_ref, weff_ref, b2_ref, o_ref):
    # fc1 + bias + ReLU (bias-add / ReLU in f32 on the VPU).
    h = jnp.dot(x_ref[...], w1_ref[...], preferred_element_type=jnp.float32)
    h = jnp.maximum(h + b1_ref[...], 0.0)
    # fc2 with the LoRA update already folded into weff (lane-dense, padded to 128).
    out = jnp.dot(h, weff_ref[...], preferred_element_type=jnp.float32) + b2_ref[...]
    o_ref[...] = out.astype(o_ref.dtype)


def simple_mlp_lora(x, w1, b1, w2, b2, wd, wu, *, alpha=16, r=4, block_b=128):
    """Forward pass of SimpleMLP with a LoRA adapter on fc2.

    x:  (B, D_in) float32
    w1: (D_in, D_hid)  = fc1.weight.T      b1: (1, D_hid)
    w2: (D_hid, D_out) = fc2.weight.T      b2: (1, D_out)
    wd: (D_hid, r)     = lora_down.weight.T
    wu: (r, D_out)     = lora_up.weight.T
    """
    B, D_in = x.shape
    D_hid, D_out = w2.shape
    scaling = float(alpha) / float(r)

    # ---- Fold the LoRA branch (exact for the forward pass) -------------------
    w_eff = w2 + (wd @ wu) * scaling

    # ---- Lane-dense output: pad the output feature dim to a multiple of 128 --
    LANE = 128
    d_out_p = _round_up(max(D_out, 1), LANE)
    w_eff_p = jnp.zeros((D_hid, d_out_p), w_eff.dtype).at[:, :D_out].set(w_eff)
    b2_p = jnp.zeros((1, d_out_p), b2.dtype).at[:, :D_out].set(b2)

    # ---- Batch tiling: sublane-aligned tile, grid over batch -----------------
    tb = min(block_b, _round_up(B, 8))
    b_pad = _round_up(B, tb)
    if b_pad != B:
        x = jnp.zeros((b_pad, D_in), x.dtype).at[:B, :].set(x)

    grid = (pl.cdiv(b_pad, tb),)

    out = pl.pallas_call(
        _mlp_kernel,
        out_shape=jax.ShapeDtypeStruct((b_pad, d_out_p), jnp.float32),
        grid=grid,
        in_specs=[
            pl.BlockSpec((tb, D_in), lambda i: (i, 0)),        # x: tiled over batch
            pl.BlockSpec((D_in, D_hid), lambda i: (0, 0)),     # w1: resident
            pl.BlockSpec((1, D_hid), lambda i: (0, 0)),        # b1: resident
            pl.BlockSpec((D_hid, d_out_p), lambda i: (0, 0)),  # w_eff: resident
            pl.BlockSpec((1, d_out_p), lambda i: (0, 0)),      # b2: resident
        ],
        out_specs=pl.BlockSpec((tb, d_out_p), lambda i: (i, 0)),
        compiler_params=pltpu.CompilerParams(
            dimension_semantics=("parallel",)),
    )(x, w1, b1, w_eff_p, b2_p)

    # Strip batch / lane padding.
    return out[:B, :D_out]


def init_params(key, input_dim=8, hidden_dim=16, output_dim=2, r=4):
    """Deterministic params mirroring PyTorch shapes, pre-transposed to (in, out).

    LoRA down/up are zero-initialized, exactly like the module.
    """
    k1, k2, k3, k4 = jax.random.split(key, 4)
    bound1 = 1.0 / jnp.sqrt(input_dim)
    bound2 = 1.0 / jnp.sqrt(hidden_dim)

    w1 = jax.random.uniform(k1, (input_dim, hidden_dim), jnp.float32, -bound1, bound1)
    b1 = jax.random.uniform(k2, (1, hidden_dim), jnp.float32, -bound1, bound1)
    w2 = jax.random.uniform(k3, (hidden_dim, output_dim), jnp.float32, -bound2, bound2)
    b2 = jax.random.uniform(k4, (1, output_dim), jnp.float32, -bound2, bound2)

    wd = jnp.zeros((hidden_dim, r), jnp.float32)   # lora_down.weight.T
    wu = jnp.zeros((r, output_dim), jnp.float32)   # lora_up.weight.T
    return w1, b1, w2, b2, wd, wu


def reference_forward(x, w1, b1, w2, b2, wd, wu, *, alpha=16, r=4):
    scaling = float(alpha) / float(r)
    h = jnp.maximum(x @ w1 + b1, 0.0)
    return (h @ w2 + b2) + ((h @ wd) @ wu) * scaling


if __name__ == "__main__":
    key = jax.random.PRNGKey(0)
    kx, kp, kd, ku = jax.random.split(key, 4)

    B, D_in, D_hid, D_out, R, ALPHA = 2, 8, 16, 2, 4, 16

    x = jax.random.normal(kx, (B, D_in), jnp.float32)
    w1, b1, w2, b2, wd, wu = init_params(kp, D_in, D_hid, D_out, R)

    # 1) Module-faithful case: zero-initialized LoRA (adapter contributes 0).
    out = simple_mlp_lora(x, w1, b1, w2, b2, wd, wu, alpha=ALPHA, r=R)
    out = jax.block_until_ready(out)
    ref = reference_forward(x, w1, b1, w2, b2, wd, wu, alpha=ALPHA, r=R)
    assert out.shape == (B, D_out)
    assert jnp.allclose(out, ref, atol=1e-5, rtol=1e-5)

    # 2) Exercise the folded LoRA path with non-zero adapter weights.
    wd_nz = 0.1 * jax.random.normal(kd, (D_hid, R), jnp.float32)
    wu_nz = 0.1 * jax.random.normal(ku, (R, D_out), jnp.float32)
    out2 = simple_mlp_lora(x, w1, b1, w2, b2, wd_nz, wu_nz, alpha=ALPHA, r=R)
    out2 = jax.block_until_ready(out2)
    ref2 = reference_forward(x, w1, b1, w2, b2, wd_nz, wu_nz, alpha=ALPHA, r=R)
    assert jnp.allclose(out2, ref2, atol=1e-5, rtol=1e-5)

    print("KERNEL_OK")
</pallas_src>

<mosaic_0001>
module attributes {stable_mosaic.version = 11 : i64} {
  func.func @_mlp_kernel(%arg0: i32, %arg1: memref<8x8xf32, #tpu.memory_space<vmem>>, %arg2: memref<8x16xf32, #tpu.memory_space<vmem>>, %arg3: memref<1x16xf32, #tpu.memory_space<vmem>>, %arg4: memref<16x128xf32, #tpu.memory_space<vmem>>, %arg5: memref<1x128xf32, #tpu.memory_space<vmem>>, %arg6: memref<8x128xf32, #tpu.memory_space<vmem>>) attributes {dimension_semantics = [#tpu.dimension_semantics<parallel>], iteration_bounds = array<i64: 1>, scalar_prefetch = 0 : i64, scratch_operands = 0 : i64, tpu.core_type = #tpu.core_type<tc>, window_params = [{transform_indices = @transform_0, window_bounds = array<i64: 8, 8>}, {pipeline_mode = #tpu.pipeline_mode<synchronous>, transform_indices = @transform_1, window_bounds = array<i64: 8, 16>}, {pipeline_mode = #tpu.pipeline_mode<synchronous>, transform_indices = @transform_2, window_bounds = array<i64: 1, 16>}, {pipeline_mode = #tpu.pipeline_mode<synchronous>, transform_indices = @transform_3, window_bounds = array<i64: 16, 128>}, {pipeline_mode = #tpu.pipeline_mode<synchronous>, transform_indices = @transform_4, window_bounds = array<i64: 1, 128>}, {transform_indices = @transform_5, window_bounds = array<i64: 8, 128>}]} {
    %c0 = arith.constant 0 : index
    %c0_0 = arith.constant 0 : index
    %0 = vector.load %arg1[%c0, %c0_0] : memref<8x8xf32, #tpu.memory_space<vmem>>, vector<8x8xf32>
    %c0_1 = arith.constant 0 : index
    %c0_2 = arith.constant 0 : index
    %1 = vector.load %arg2[%c0_1, %c0_2] : memref<8x16xf32, #tpu.memory_space<vmem>>, vector<8x16xf32>
    %cst = arith.constant dense<0.000000e+00> : vector<8x16xf32>
    %2 = tpu.matmul %0, %1, %cst {dimension_numbers = #tpu.dot_dimension_numbers<[1], [0], [0], [1], [0, 0, 1, 1], [], []>} : vector<8x8xf32>, vector<8x16xf32>, vector<8x16xf32> -> vector<8x16xf32>
    %c0_3 = arith.constant 0 : index
    %c0_4 = arith.constant 0 : index
    %3 = vector.load %arg3[%c0_3, %c0_4] : memref<1x16xf32, #tpu.memory_space<vmem>>, vector<1x16xf32>
    %4 = vector.broadcast %3 : vector<1x16xf32> to vector<8x16xf32>
    %5 = arith.addf %2, %4 : vector<8x16xf32>
    %cst_5 = arith.constant 0.000000e+00 : f32
    %6 = vector.broadcast %cst_5 : f32 to vector<8x16xf32>
    %7 = arith.maximumf %5, %6 : vector<8x16xf32>
    %c0_6 = arith.constant 0 : index
    %c0_7 = arith.constant 0 : index
    %8 = vector.load %arg4[%c0_6, %c0_7] : memref<16x128xf32, #tpu.memory_space<vmem>>, vector<16x128xf32>
    %cst_8 = arith.constant dense<0.000000e+00> : vector<8x128xf32>
    %9 = tpu.matmul %7, %8, %cst_8 {dimension_numbers = #tpu.dot_dimension_numbers<[1], [0], [0], [1], [0, 0, 1, 1], [], []>} : vector<8x16xf32>, vector<16x128xf32>, vector<8x128xf32> -> vector<8x128xf32>
    %c0_9 = arith.constant 0 : index
    %c0_10 = arith.constant 0 : index
    %10 = vector.load %arg5[%c0_9, %c0_10] : memref<1x128xf32, #tpu.memory_space<vmem>>, vector<1x128xf32>
    %11 = vector.broadcast %10 : vector<1x128xf32> to vector<8x128xf32>
    %12 = arith.addf %9, %11 : vector<8x128xf32>
    %c0_11 = arith.constant 0 : index
    %c0_12 = arith.constant 0 : index
    %13 = vector.load %arg6[%c0_11, %c0_12] : memref<8x128xf32, #tpu.memory_space<vmem>>, vector<8x128xf32>
    tpu.vector_store %arg6[%c0_11, %c0_12], %12 {strides = array<i32>} : memref<8x128xf32, #tpu.memory_space<vmem>>, vector<8x128xf32>,
    return
  }
  func.func @transform_0(%arg0: i32) -> (i32, i32) {
    %c0_i32 = arith.constant 0 : i32
    %c0_i32_0 = arith.constant 0 : i32
    return %arg0, %c0_i32 : i32, i32
  }
  func.func @transform_1(%arg0: i32) -> (i32, i32) {
    %c0_i32 = arith.constant 0 : i32
    %c0_i32_0 = arith.constant 0 : i32
    %c0_i32_1 = arith.constant 0 : i32
    return %c0_i32, %c0_i32_0 : i32, i32
  }
  func.func @transform_2(%arg0: i32) -> (i32, i32) {
    %c0_i32 = arith.constant 0 : i32
    %c0_i32_0 = arith.constant 0 : i32
    %c0_i32_1 = arith.constant 0 : i32
    return %c0_i32, %c0_i32_0 : i32, i32
  }
  func.func @transform_3(%arg0: i32) -> (i32, i32) {
    %c0_i32 = arith.constant 0 : i32
    %c0_i32_0 = arith.constant 0 : i32
    %c0_i32_1 = arith.constant 0 : i32
    return %c0_i32, %c0_i32_0 : i32, i32
  }
  func.func @transform_4(%arg0: i32) -> (i32, i32) {
    %c0_i32 = arith.constant 0 : i32
    %c0_i32_0 = arith.constant 0 : i32
    %c0_i32_1 = arith.constant 0 : i32
    return %c0_i32, %c0_i32_0 : i32, i32
  }
  func.func @transform_5(%arg0: i32) -> (i32, i32) {
    %c0_i32 = arith.constant 0 : i32
    %c0_i32_0 = arith.constant 0 : i32
    return %arg0, %c0_i32 : i32, i32
  }
}

</mosaic_0001>

<bundles_post_ra>
// kernel: tpu_custom_call.1
= control target key start
LH: loop header
LB: loop body
LE: loop exit
PB: predicated region body
PF: predicated region fallthrough
CT: control target
= control target key end

     0   :  { %10 = vsyncpa [#allocation3], 0  ;;  %s462_s0 = inlined_call_operand.hbm [shape: f32[8,8], index: 0, kind: input, shape index: {}]   ;;  %s463_s1 = inlined_call_operand.hbm [shape: f32[8,16], index: 1, kind: input, shape index: {}]   ;;  %s464_s2 = inlined_call_operand.vmem [shape: f32[1,16], index: 2, kind: input, shape index: {}]   ;;  %s465_s3 = inlined_call_operand.hbm [shape: f32[16,128], index: 3, kind: input, shape index: {}]   ;;  %s466_s4 = inlined_call_operand.vmem [shape: f32[1,128], index: 4, kind: input, shape index: {}]   ;;  %s467_s5 = inlined_call_operand.hbm [shape: f32[8,128], index: 5, kind: output, shape index: {}]  }
   0x1   :  { %11 = vsyncpa [#allocation6], 0 }
   0x2   :  { %12 = vsyncpa [#allocation4], 0  ;;  %s369_s18 = smov [#allocation5]   ;;  %s370_s20 = smov [#allocation2]  }
   0x3   :  { %s29_s19 = sshll.u32 %s369_s18, 4  ;;  %s19_s21 = sshll.u32 %s370_s20, 4  ;;  %s30_s19 = int_to_ptr.vmem [resolvable:$true] %s29_s19  ;;  %s20_s21 = int_to_ptr.vmem [resolvable:$true] %s19_s21 }
   0x4   :  { %s275_s24 = scalar_lea.hbm %s463_s1, 128 }
   0x5   :  { %p276_p0 = scmp.ne.s32.totalorder %s463_s1, %s275_s24  ;;  %p279_p1 = scmp.lt.u32.totalorder %s275_s24, %s463_s1 }
   0x7   :  { %p281_p2 = pnand %p279_p1, %p276_p0 }
   0x9   :  { %284 = shalt.err (!%p281_p2)
}
   0xa   :  { %s285_s29 = scalar_lea.vmem %s30_s19, 128  ;;  %p290_p4 = scmp.lt.s32.totalorder %s30_s19, %s30_s19 }
   0xb   :  { %p286_p3 = scmp.ne.s32.totalorder %s30_s19, %s285_s29  ;;  %p291_p5 = scmp.lt.s32.totalorder %s285_s29, %s285_s29 }
   0xd   :  { %p292_p6 = por %p291_p5, %p290_p4 }
   0xf   :  { %p293_p7 = pnand %p292_p6, %p286_p3 }
  0x11   :  { %296 = shalt.err (!%p293_p7)
}
  0x12   :  { %32 = dma.hbm_to_vmem [thread:$0]  %s463_s1, 128, %s30_s19, [#allocation6]  }
  0x13   :  { %s297_s9 = scalar_lea.hbm %s462_s0, 128 }
  0x14   :  { %p298_p8 = scmp.ne.s32.totalorder %s462_s0, %s297_s9  ;;  %p301_p9 = scmp.lt.u32.totalorder %s297_s9, %s462_s0 }
  0x16   :  { %p303_p10 = pnand %p301_p9, %p298_p8 }
  0x18   :  { %306 = shalt.err (!%p303_p10)
}
  0x19   :  { %s307_s14 = scalar_lea.vmem %s20_s21, 128  ;;  %p312_p12 = scmp.lt.s32.totalorder %s20_s21, %s20_s21 }
  0x1a   :  { %p308_p11 = scmp.ne.s32.totalorder %s20_s21, %s307_s14  ;;  %p313_p13 = scmp.lt.s32.totalorder %s307_s14, %s307_s14 }
  0x1c   :  { %p314_p0 = por %p313_p13, %p312_p12 }
  0x1e   :  { %p315_p1 = pnand %p314_p0, %p308_p11 }
  0x20   :  { %318 = shalt.err (!%p315_p1)
}
  0x21   :  { %22 = dma.hbm_to_vmem [thread:$0]  %s462_s0, 128, %s20_s21, [#allocation3]  }
  0x22   :  { %s371_s16 = smov [#allocation7]   ;;  %s319_s20 = scalar_lea.hbm %s465_s3, 256 }
  0x23   :  { %s40_s17 = sshll.u32 %s371_s16, 4  ;;  %p320_p2 = scmp.ne.s32.totalorder %s465_s3, %s319_s20  ;;  %s41_s17 = int_to_ptr.vmem [resolvable:$true] %s40_s17 }
  0x24   :  { %p323_p3 = scmp.lt.u32.totalorder %s319_s20, %s465_s3 }
  0x26   :  { %p325_p4 = pnand %p323_p3, %p320_p2 }
  0x28   :  { %328 = shalt.err (!%p325_p4)
}
  0x29   :  { %s329_s26 = scalar_lea.vmem %s41_s17, 256  ;;  %p334_p6 = scmp.lt.s32.totalorder %s41_s17, %s41_s17 }
  0x2a   :  { %p330_p5 = scmp.ne.s32.totalorder %s41_s17, %s329_s26  ;;  %p335_p7 = scmp.lt.s32.totalorder %s329_s26, %s329_s26 }
  0x2c   :  { %p336_p8 = por %p335_p7, %p334_p6 }
  0x2e   :  { %p337_p9 = pnand %p336_p8, %p330_p5 }
  0x30   :  { %340 = shalt.err (!%p337_p9)
}
  0x31   :  { %s372_s0 = smov 128   ;;  %s373_s21 = smov 8  }
  0x32   :  { %46 = dma.hbm_to_vmem [thread:$0]  %s465_s3, 256, %s41_s17, [#allocation6], %s372_s0, %s372_s0, %s373_s21  }
  0x33   :  { %363 = dma.done.wait [#allocation3], 128  }
  0x34   :  { %364 = vsyncadd [#allocation3], 4294967168 }
  0x35   :  { %365 = dma.done.wait [#allocation6], 384  }
  0x36   :  { %366 = vsyncadd [#allocation6], 4294966912  ;;  %v374_v0 = vmov 0.0   ;;  %vm375_vm0 = vmmov 0   ;;  %vm67_vm1 = vcmask 64512   ;;  %v59_v1 = vld [vmem:[#allocation5] sm:$0xff] }
  0x37   :  { %251 = vmatprep.subr.mxu0 %v374_v0  ;;  %253 = vmatprep.mubr.msk.f32.mxu0 %vm375_vm0, %v374_v0  ;;  %v58_v2 = vld [vmem:[#allocation2] sm:$0xff]  ;;  %v142_v3 = vld [vmem:[#allocation7] sm:$0xff]  ;;  %v143_v4 = vld [vmem:[#allocation7 + $0x8] sm:$0xff]  ;;  %v376_v6 = vmov 0.0|0.0   ;;  %vm151_vm2 = vcmask 130048   ;;  %s377_s7 = smov [#allocation8]  }
  0x38   :  { %260 = vmatprep.mubr.msk.f32.mxu1 %vm375_vm0, %v374_v0  ;;  %252 = vmatpush3.msra.mxu0 %v59_v1  ;;  %v264_v5 = vpack.c.bf16 %v143_v4, %v142_v3  ;;  %v242_v7 = vld [vmem:[%s464_s2] ss:$0 sm:$0xff]  ;;  %s232_s8 = sshll.u32 %s377_s7, 4  ;;  %s233_s8 = int_to_ptr.vmem [resolvable:$true] %s232_s8 }
  0x39   :  { %254 = vmatmul.mubr.msk.f32.vlgmr.msra.gmra.mrb[0].mxu0 %vm67_vm1, %v58_v2  ;;  %263 = vmatprep.subr.bf16.mxu1 %v376_v6  ;;  %v244_v12 = vld [vmem:[%s466_s4] ss:$0 sm:$0xff]  ;;  %s341_s9 = scalar_lea.vmem %s233_s8, 128  ;;  %p346_p11 = scmp.lt.s32.totalorder %s233_s8, %s233_s8 }
  0x3a   :  { %265 = vmatpush3.bf16.msra.mxu1 %v264_v5  ;;  %p342_p10 = scmp.ne.s32.totalorder %s233_s8, %s341_s9  ;;  %p347_p12 = scmp.lt.s32.totalorder %s341_s9, %s341_s9 }
  0x3c   :  { %p348_p13 = por %p347_p12, %p346_p11 }
  0x3e   :  { %p349_p0 = pnand %p348_p13, %p342_p10 }
 0x10c   :  { %v137_v8 = vpop.f32.mrb[0].mxu0 }
 0x10d   :  { %v138_v9 = vadd.f32 %v242_v7, %v137_v8  ;;  %v255_v10 = vpop.f32.mrb[1].mxu0 }
 0x10f   :  { %v141_v11 = vmax.f32 %v138_v9, 0.0 }
 0x111   :  { %261 = vmatmul.mubr.msk.f32.vlgmr.msra.gmra.mrb[0].mxu1 %vm151_vm2, %v141_v11 }
 0x1e4   :  { %v221_v13 = vpop.f32.mrb[0].mxu1 }
 0x1e5   :  { %v222_v14 = vadd.f32 %v244_v12, %v221_v13  ;;  %v262_v15 = vpop.f32.mrb[1].mxu1 }
 0x1e7   :  { %225 = vst [vmem:[#allocation8] sm:$0xff] %v222_v14 }
 0x1e8   :  { %352 = shalt.err (!%p349_p0)
}
 0x1e9   :  { %s353_s11 = scalar_lea.hbm %s467_s5, 128 }
 0x1ea   :  { %p354_p1 = scmp.ne.s32.totalorder %s467_s5, %s353_s11  ;;  %p357_p2 = scmp.lt.u32.totalorder %s353_s11, %s467_s5 }
 0x1ec   :  { %p359_p3 = pnand %p357_p2, %p354_p1 }
 0x1ee   :  { %362 = shalt.err (!%p359_p3)
}
 0x1ef   :  { %235 = dma.vmem_to_hbm [thread:$0]  %s233_s8, 128, %s467_s5, [#allocation4]  }
 0x1f0   :  { %367 = dma.done.wait [#allocation4], 128  }
 0x1f1   :  { %368 = vsyncadd [#allocation4], 4294967168 }
 0x1f2   :  { %239 = vsyncpa [#allocation3], 1 }
 0x1f3   :  { %240 = vsyncpa [#allocation6], 1 }
 0x1f4   :  { %241 = vsyncpa [#allocation4], 1 }

</bundles_post_ra>
